<compile_context>
chip_gen: v7x
topology: tpu7x:2x2x1
jax: 0.10.0
libtpu: 0.0.40
codegen_flags: <defaults>
</compile_context>

<pallas_src>
from functools import partial

import jax
import jax.numpy as jnp
from jax.experimental import pallas as pl
from jax.experimental.pallas import tpu as pltpu

NUM_RHYME_CLASSES = 45   # len(StropheParams.RHYME), from the CE weight vector
PADDED_C = 128           # lane-dense padded class dimension

# CrossEntropyLoss class weights, verbatim from the module
CE_WEIGHTS = [1, 1, 1, 1, 1, 1, 1.25, 1.25, 1.25, 1.5, 1.5, 1.5, 1.5, 1.5,
              1.5, 1.5, 2, 2, 2.5, 2.5, 2.5, 2.5, 3, 3, 3, 3, 3, 4, 4, 4, 4,
              4, 4, 5, 5, 5, 6, 6, 6, 6, 6, 6, 7, 7, 1]


def _rhyme_head_kernel(x_ref, w_ref, b_ref, cw_ref, y_ref,
                       probs_ref, loss_ref, acc_ref):
    """Per-batch-tile: CLS rows -> Linear -> softmax -> weighted CE partials.

    x_ref:   (TB, H)   VMEM       CLS hidden states for this batch tile
    w_ref:   (H, 128)  VMEM       regressor weight, transposed + lane-padded
    b_ref:   (1, 128)  VMEM f32   bias; padded lanes = -1e30 (must stay f32)
    cw_ref:  (1, 128)  VMEM f32   CE class weights; padded lanes = 0
    y_ref:   (TB, 1)   VMEM i32   rhyme labels for this tile
    probs_ref: (TB, 128) VMEM f32 softmax(rhyme_regression), lane-dense
    loss_ref:  (1, 1)    SMEM f32 weighted-mean CE loss (written on last step)
    acc_ref:   (2,)      SMEM f32 running [numerator, denominator]
    """
    i = pl.program_id(0)

    @pl.when(i == 0)
    def _():
        acc_ref[0] = jnp.float32(0.0)
        acc_ref[1] = jnp.float32(0.0)

    # rhyme_regressor: logits = x @ W^T + b (MXU, f32 accumulation). bf16
    # operands recommended on v6e/v7x; no cast when dtypes already match.
    x = x_ref[...]
    w = w_ref[...]
    if x.dtype != w.dtype:          # trace-time branch; avoided when matched
        x = x.astype(w.dtype)
    logits = jnp.dot(x, w, preferred_element_type=jnp.float32)
    logits = logits + b_ref[...]    # padded lanes get -1e30

    # torch.softmax(..., dim=1) over the 128-lane padded class dim; padded
    # lanes underflow to exactly 0 probability.
    m = jnp.max(logits, axis=-1, keepdims=True)
    e = jnp.exp(logits - m)
    probs = e / jnp.sum(e, axis=-1, keepdims=True)
    probs_ref[...] = probs.astype(probs_ref.dtype)

    # CrossEntropyLoss(weight=cw)(probs, y) — on the already-softmaxed values,
    # exactly as the PyTorch module does.  Padded probs are exactly 0, so
    # exp(pad) == 1 exactly and the padded lanes can be subtracted out of the
    # log-sum-exp instead of masked (one fewer (TB,128) select).
    lse = jnp.log(jnp.sum(jnp.exp(probs), axis=-1, keepdims=True)
                  - float(PADDED_C - NUM_RHYME_CLASSES))
    logp = probs - lse                           # log_softmax(probs), real lanes

    tb, c = probs.shape
    lane = jax.lax.broadcasted_iota(jnp.int32, (tb, c), 1)
    onehot = (lane == y_ref[...]).astype(jnp.float32)
    w_sel = onehot * cw_ref[...]                 # w[y_i] scattered; pads are 0
    acc_ref[0] += -jnp.sum(w_sel * logp)         # sum_i w[y_i] * (-logp[i, y_i])
    acc_ref[1] += jnp.sum(w_sel)                 # weighted-mean denominator

    @pl.when(i == pl.num_programs(0) - 1)
    def _():
        # Divide only once, at the end (weighted mean over the whole batch).
        loss_ref[0, 0] = acc_ref[0] / acc_ref[1]


def prepare_rhyme_head_params(weight, bias, class_weights,
                              matmul_dtype=jnp.float32):
    """One-time parameter prep (hoisted out of the per-forward path).

    weight: (45, H) torch Linear layout; bias, class_weights: (45,)
    Returns (w_t (H,128), b (1,128) f32, cw (1,128) f32).
    matmul_dtype=jnp.bfloat16 recommended on v6e/v7x; f32 is exact.
    The -1e30 bias sentinel must stay f32 (bf16 would overflow to -inf).
    """
    C, H = weight.shape
    pad = PADDED_C - C
    w_t = jnp.pad(jnp.transpose(weight).astype(jnp.float32),
                  ((0, 0), (0, pad))).astype(matmul_dtype)
    b = jnp.pad(bias.astype(jnp.float32), (0, pad),
                constant_values=-1e30).reshape(1, PADDED_C)
    cw = jnp.pad(class_weights.astype(jnp.float32),
                 (0, pad)).reshape(1, PADDED_C)
    return w_t, b, cw


@partial(jax.jit, static_argnames=("block_b",))
def rhyme_validator_forward(last_hidden, params, rhyme, block_b=256):
    """Pallas version of RhymeValidator.forward head.

    last_hidden: (B, S, H) backbone hidden states (bf16 recommended; CLS rows
                 are read directly via BlockSpec, the rest of S is never DMA'd)
    params: output of prepare_rhyme_head_params
    rhyme: (B,) int class indices
    Returns (softmaxed (B, 45), rhyme_loss scalar).
    """
    w_t, b, cw = params
    B, S, H = last_hidden.shape
    y = rhyme.reshape(B, 1).astype(jnp.int32)

    # Batch tile: multiple of 8 sublanes (or the whole batch).  Buffers are
    # tiny (TB*H*2 bytes double-buffered) so this fits v5e's 16 MiB scoped
    # default and v7x's 32 MiB scoped / 64 MiB physical VMEM comfortably.
    tb = block_b if (B > block_b and B % block_b == 0) else B
    # TODO(synk): ragged B (B % block_b != 0) falls back to a single tile;
    # add in-kernel row masking of the CE partials to tile it too.
    grid = (B // tb,)

    if H % 128 == 0:
        # Free (bitcast) flatten (B, S, H) -> (B, S*H): a (tb, H) block at
        # column-block 0 is exactly the CLS rows, auto double-buffered.
        x_in = last_hidden.reshape(B, S * H)
    else:
        # TODO(synk): H not a multiple of 128 — let XLA compact the CLS rows
        # first instead of emitting a sub-128-lane block.
        x_in = last_hidden[:, 0, :]
    # If the strided CLS DMA is still exposed at very large S, add
    # pipeline_mode=pl.Buffered(3) to this spec for one extra lookahead buffer.
    x_spec = pl.BlockSpec((tb, H), lambda i: (i, 0))

    # TODO(synk): the B axis is "arbitrary" because the CE num/den accumulate
    # in SMEM across grid steps; for dual-TC v7x, emit per-tile partials and
    # reduce in the wrapper so the axis can be "parallel".
    probs_padded, loss = pl.pallas_call(
        _rhyme_head_kernel,
        grid=grid,
        out_shape=(
            jax.ShapeDtypeStruct((B, PADDED_C), jnp.float32),
            jax.ShapeDtypeStruct((1, 1), jnp.float32),
        ),
        in_specs=[
            x_spec,
            pl.BlockSpec((H, PADDED_C), lambda i: (0, 0)),   # weight (resident)
            pl.BlockSpec((1, PADDED_C), lambda i: (0, 0)),   # bias
            pl.BlockSpec((1, PADDED_C), lambda i: (0, 0)),   # CE class weights
            pl.BlockSpec((tb, 1), lambda i: (i, 0)),         # labels
        ],
        out_specs=(
            pl.BlockSpec((tb, PADDED_C), lambda i: (i, 0)),  # lane-dense probs
            pl.BlockSpec(memory_space=pltpu.MemorySpace.SMEM),
        ),
        scratch_shapes=[pltpu.SMEM((2,), jnp.float32)],      # [num, den]
        compiler_params=pltpu.CompilerParams(
            dimension_semantics=("arbitrary",)),
    )(x_in, w_t, b, cw, y)

    # Consumers that tolerate the 128-lane padding can skip this slice.
    return probs_padded[:, :NUM_RHYME_CLASSES], loss[0, 0]


def _reference_forward(last_hidden, weight, bias, class_weights, rhyme):
    """Pure-JAX reference matching the PyTorch semantics."""
    x = last_hidden[:, 0, :].astype(jnp.float32)
    logits = x @ weight.T + bias
    probs = jax.nn.softmax(logits, axis=1)
    logp = jax.nn.log_softmax(probs, axis=1)
    w_sel = class_weights[rhyme]
    nll = -jnp.take_along_axis(logp, rhyme[:, None], axis=1)[:, 0]
    loss = jnp.sum(w_sel * nll) / jnp.sum(w_sel)
    return probs, loss


if __name__ == "__main__":
    C = NUM_RHYME_CLASSES
    B, S, H = 2, 8, 128

    key = jax.random.PRNGKey(0)
    k_hidden, k_w, k_b, k_h2, k_y2 = jax.random.split(key, 5)

    # Deterministic synthetic "backbone" output and regressor params.
    last_hidden = jax.random.normal(k_hidden, (B, S, H), dtype=jnp.float32)
    weight = 0.02 * jax.random.normal(k_w, (C, H), dtype=jnp.float32)
    bias = 0.01 * jax.random.normal(k_b, (C,), dtype=jnp.float32)
    class_weights = jnp.asarray(CE_WEIGHTS, dtype=jnp.float32)
    rhyme = jnp.asarray([3, 17], dtype=jnp.int32)

    ref_probs, ref_loss = _reference_forward(
        last_hidden, weight, bias, class_weights, rhyme)

    # Exact f32 matmul path (single batch tile).
    params_f32 = prepare_rhyme_head_params(
        weight, bias, class_weights, matmul_dtype=jnp.float32)
    probs, loss = rhyme_validator_forward(last_hidden, params_f32, rhyme)
    jax.block_until_ready((probs, loss))
    assert probs.shape == (B, C)
    assert jnp.allclose(probs, ref_probs, atol=1e-5, rtol=1e-5)
    assert jnp.allclose(loss, ref_loss, atol=1e-5, rtol=1e-5)

    # bf16 hidden states + bf16 MXU operands (v6e/v7x recommendation);
    # softmax/CE math stays f32 inside the kernel.
    params_bf16 = prepare_rhyme_head_params(
        weight, bias, class_weights, matmul_dtype=jnp.bfloat16)
    probs_bf16, loss_bf16 = rhyme_validator_forward(
        last_hidden.astype(jnp.bfloat16), params_bf16, rhyme)
    jax.block_until_ready((probs_bf16, loss_bf16))
    assert jnp.allclose(probs_bf16, ref_probs, atol=5e-3, rtol=5e-2)
    assert jnp.allclose(loss_bf16, ref_loss, atol=5e-3, rtol=5e-2)

    # Multi-tile grid path: exercises the batch grid and the SMEM CE
    # accumulator across grid steps (B=16, TB=8 -> grid=(2,)).
    B2 = 16
    last_hidden2 = jax.random.normal(k_h2, (B2, S, H), dtype=jnp.float32)
    rhyme2 = jax.random.randint(k_y2, (B2,), 0, C, dtype=jnp.int32)
    ref_probs2, ref_loss2 = _reference_forward(
        last_hidden2, weight, bias, class_weights, rhyme2)
    probs2, loss2 = rhyme_validator_forward(
        last_hidden2, params_f32, rhyme2, block_b=8)
    jax.block_until_ready((probs2, loss2))
    assert probs2.shape == (B2, C)
    assert jnp.allclose(probs2, ref_probs2, atol=1e-5, rtol=1e-5)
    assert jnp.allclose(loss2, ref_loss2, atol=1e-5, rtol=1e-5)

    print("KERNEL_OK")
</pallas_src>

<mosaic_0001>
module attributes {stable_mosaic.version = 11 : i64} {
  func.func @_rhyme_head_kernel(%arg0: i32, %arg1: memref<2x128xf32, #tpu.memory_space<vmem>>, %arg2: memref<128x128xf32, #tpu.memory_space<vmem>>, %arg3: memref<1x128xf32, #tpu.memory_space<vmem>>, %arg4: memref<1x128xf32, #tpu.memory_space<vmem>>, %arg5: memref<2x1xi32, #tpu.memory_space<vmem>>, %arg6: memref<2x128xf32, #tpu.memory_space<vmem>>, %arg7: memref<1x1xf32, #tpu.memory_space<smem>>, %arg8: memref<2xf32, #tpu.memory_space<smem>>) attributes {dimension_semantics = [#tpu.dimension_semantics<arbitrary>], iteration_bounds = array<i64: 1>, scalar_prefetch = 0 : i64, scratch_operands = 1 : i64, tpu.core_type = #tpu.core_type<tc>, window_params = [{transform_indices = @transform_0, window_bounds = array<i64: 2, 128>}, {pipeline_mode = #tpu.pipeline_mode<synchronous>, transform_indices = @transform_1, window_bounds = array<i64: 128, 128>}, {pipeline_mode = #tpu.pipeline_mode<synchronous>, transform_indices = @transform_2, window_bounds = array<i64: 1, 128>}, {pipeline_mode = #tpu.pipeline_mode<synchronous>, transform_indices = @transform_3, window_bounds = array<i64: 1, 128>}, {transform_indices = @transform_4, window_bounds = array<i64: 2, 1>}, {transform_indices = @transform_5, window_bounds = array<i64: 2, 128>}, {transform_indices = @transform_6, window_bounds = array<i64: 1, 1>}]} {
    %c0_i32 = arith.constant 0 : i32
    %0 = arith.cmpi eq, %arg0, %c0_i32 : i32
    %1 = arith.extui %0 : i1 to i32
    %c0_i32_0 = arith.constant 0 : i32
    %2 = arith.cmpi ne, %1, %c0_i32_0 : i32
    scf.if %2 {
      %cst_24 = arith.constant 0.000000e+00 : f32
      %c0_25 = arith.constant 0 : index
      %55 = memref.load %arg8[%c0_25] : memref<2xf32, #tpu.memory_space<smem>>
      memref.store %cst_24, %arg8[%c0_25] : memref<2xf32, #tpu.memory_space<smem>>
      %cst_26 = arith.constant 0.000000e+00 : f32
      %c1_27 = arith.constant 1 : index
      %56 = memref.load %arg8[%c1_27] : memref<2xf32, #tpu.memory_space<smem>>
      memref.store %cst_26, %arg8[%c1_27] : memref<2xf32, #tpu.memory_space<smem>>
    } else {
    }
    %c0 = arith.constant 0 : index
    %c0_1 = arith.constant 0 : index
    %3 = vector.load %arg1[%c0, %c0_1] : memref<2x128xf32, #tpu.memory_space<vmem>>, vector<2x128xf32>
    %c0_2 = arith.constant 0 : index
    %c0_3 = arith.constant 0 : index
    %4 = vector.load %arg2[%c0_2, %c0_3] : memref<128x128xf32, #tpu.memory_space<vmem>>, vector<128x128xf32>
    %cst = arith.constant dense<0.000000e+00> : vector<2x128xf32>
    %5 = tpu.matmul %3, %4, %cst {dimension_numbers = #tpu.dot_dimension_numbers<[1], [0], [0], [1], [0, 0, 1, 1], [], []>} : vector<2x128xf32>, vector<128x128xf32>, vector<2x128xf32> -> vector<2x128xf32>
    %c0_4 = arith.constant 0 : index
    %c0_5 = arith.constant 0 : index
    %6 = vector.load %arg3[%c0_4, %c0_5] : memref<1x128xf32, #tpu.memory_space<vmem>>, vector<1x128xf32>
    %7 = vector.broadcast %6 : vector<1x128xf32> to vector<2x128xf32>
    %8 = arith.addf %5, %7 : vector<2x128xf32>
    %cst_6 = arith.constant dense<0xFF800000> : vector<2xf32>
    %9 = vector.multi_reduction <maximumf>, %8, %cst_6 [1] : vector<2x128xf32> to vector<2xf32>
    %10 = vector.shape_cast %9 : vector<2xf32> to vector<2x1xf32>
    %11 = vector.broadcast %10 : vector<2x1xf32> to vector<2x128xf32>
    %12 = arith.subf %8, %11 : vector<2x128xf32>
    %13 = math.exp %12 : vector<2x128xf32>
    %cst_7 = arith.constant dense<0.000000e+00> : vector<2xf32>
    %14 = vector.multi_reduction <add>, %13, %cst_7 [1] : vector<2x128xf32> to vector<2xf32>
    %15 = vector.shape_cast %14 : vector<2xf32> to vector<2x1xf32>
    %16 = vector.broadcast %15 : vector<2x1xf32> to vector<2x128xf32>
    %17 = arith.divf %13, %16 : vector<2x128xf32>
    %c0_8 = arith.constant 0 : index
    %c0_9 = arith.constant 0 : index
    %18 = vector.load %arg6[%c0_8, %c0_9] : memref<2x128xf32, #tpu.memory_space<vmem>>, vector<2x128xf32>
    tpu.vector_store %arg6[%c0_8, %c0_9], %17 {strides = array<i32>} : memref<2x128xf32, #tpu.memory_space<vmem>>, vector<2x128xf32>,
    %19 = math.exp %17 : vector<2x128xf32>
    %cst_10 = arith.constant dense<0.000000e+00> : vector<2xf32>
    %20 = vector.multi_reduction <add>, %19, %cst_10 [1] : vector<2x128xf32> to vector<2xf32>
    %21 = vector.shape_cast %20 : vector<2xf32> to vector<2x1xf32>
    %cst_11 = arith.constant 8.300000e+01 : f32
    %22 = vector.broadcast %cst_11 : f32 to vector<2x1xf32>
    %23 = arith.subf %21, %22 : vector<2x1xf32>
    %24 = math.log %23 : vector<2x1xf32>
    %25 = vector.broadcast %24 : vector<2x1xf32> to vector<2x128xf32>
    %26 = arith.subf %17, %25 : vector<2x128xf32>
    %27 = tpu.iota {dimensions = array<i32: 1>} : vector<2x128xi32>
    %c0_12 = arith.constant 0 : index
    %c0_13 = arith.constant 0 : index
    %28 = vector.load %arg5[%c0_12, %c0_13] : memref<2x1xi32, #tpu.memory_space<vmem>>, vector<2x1xi32>
    %29 = vector.broadcast %28 : vector<2x1xi32> to vector<2x128xi32>
    %30 = arith.cmpi eq, %27, %29 : vector<2x128xi32>
    %31 = arith.extui %30 : vector<2x128xi1> to vector<2x128xi32>
    %32 = arith.sitofp %31 : vector<2x128xi32> to vector<2x128xf32>
    %c0_14 = arith.constant 0 : index
    %c0_15 = arith.constant 0 : index
    %33 = vector.load %arg4[%c0_14, %c0_15] : memref<1x128xf32, #tpu.memory_space<vmem>>, vector<1x128xf32>
    %34 = vector.broadcast %33 : vector<1x128xf32> to vector<2x128xf32>
    %35 = arith.mulf %32, %34 : vector<2x128xf32>
    %c0_16 = arith.constant 0 : index
    %36 = memref.load %arg8[%c0_16] : memref<2xf32, #tpu.memory_space<smem>>
    %37 = arith.mulf %35, %26 : vector<2x128xf32>
    %38 = vector.shape_cast %37 : vector<2x128xf32> to vector<1x2x128xf32>
    %cst_17 = arith.constant dense<0.000000e+00> : vector<1xf32>
    %39 = vector.multi_reduction <add>, %38, %cst_17 [1, 2] : vector<1x2x128xf32> to vector<1xf32>
    %40 = vector.shape_cast %39 : vector<1xf32> to vector<1x1x1xf32>
    %41 = vector.extract %40[0, 0, 0] : f32 from vector<1x1x1xf32>
    %cst_18 = arith.constant 0.000000e+00 : f32
    %42 = arith.subf %cst_18, %41 : f32
    %43 = arith.addf %36, %42 : f32
    %c0_19 = arith.constant 0 : index
    %44 = memref.load %arg8[%c0_19] : memref<2xf32, #tpu.memory_space<smem>>
    memref.store %43, %arg8[%c0_19] : memref<2xf32, #tpu.memory_space<smem>>
    %c1 = arith.constant 1 : index
    %45 = memref.load %arg8[%c1] : memref<2xf32, #tpu.memory_space<smem>>
    %46 = vector.shape_cast %35 : vector<2x128xf32> to vector<1x2x128xf32>
    %cst_20 = arith.constant dense<0.000000e+00> : vector<1xf32>
    %47 = vector.multi_reduction <add>, %46, %cst_20 [1, 2] : vector<1x2x128xf32> to vector<1xf32>
    %48 = vector.shape_cast %47 : vector<1xf32> to vector<1x1x1xf32>
    %49 = vector.extract %48[0, 0, 0] : f32 from vector<1x1x1xf32>
    %50 = arith.addf %45, %49 : f32
    %c1_21 = arith.constant 1 : index
    %51 = memref.load %arg8[%c1_21] : memref<2xf32, #tpu.memory_space<smem>>
    memref.store %50, %arg8[%c1_21] : memref<2xf32, #tpu.memory_space<smem>>
    %c0_i32_22 = arith.constant 0 : i32
    %52 = arith.cmpi eq, %arg0, %c0_i32_22 : i32
    %53 = arith.extui %52 : i1 to i32
    %c0_i32_23 = arith.constant 0 : i32
    %54 = arith.cmpi ne, %53, %c0_i32_23 : i32
    scf.if %54 {
      %c0_24 = arith.constant 0 : index
      %55 = memref.load %arg8[%c0_24] : memref<2xf32, #tpu.memory_space<smem>>
      %c1_25 = arith.constant 1 : index
      %56 = memref.load %arg8[%c1_25] : memref<2xf32, #tpu.memory_space<smem>>
      %57 = arith.divf %55, %56 : f32
      %c0_26 = arith.constant 0 : index
      %c0_27 = arith.constant 0 : index
      %58 = memref.load %arg7[%c0_26, %c0_27] : memref<1x1xf32, #tpu.memory_space<smem>>
      memref.store %57, %arg7[%c0_26, %c0_27] : memref<1x1xf32, #tpu.memory_space<smem>>
    } else {
    }
    return
  }
  func.func @transform_0(%arg0: i32) -> (i32, i32) {
    %c0_i32 = arith.constant 0 : i32
    %c0_i32_0 = arith.constant 0 : i32
    return %arg0, %c0_i32 : i32, i32
  }
  func.func @transform_1(%arg0: i32) -> (i32, i32) {
    %c0_i32 = arith.constant 0 : i32
    %c0_i32_0 = arith.constant 0 : i32
    %c0_i32_1 = arith.constant 0 : i32
    return %c0_i32, %c0_i32_0 : i32, i32
  }
  func.func @transform_2(%arg0: i32) -> (i32, i32) {
    %c0_i32 = arith.constant 0 : i32
    %c0_i32_0 = arith.constant 0 : i32
    %c0_i32_1 = arith.constant 0 : i32
    return %c0_i32, %c0_i32_0 : i32, i32
  }
  func.func @transform_3(%arg0: i32) -> (i32, i32) {
    %c0_i32 = arith.constant 0 : i32
    %c0_i32_0 = arith.constant 0 : i32
    %c0_i32_1 = arith.constant 0 : i32
    return %c0_i32, %c0_i32_0 : i32, i32
  }
  func.func @transform_4(%arg0: i32) -> (i32, i32) {
    %c0_i32 = arith.constant 0 : i32
    %c0_i32_0 = arith.constant 0 : i32
    return %arg0, %c0_i32 : i32, i32
  }
  func.func @transform_5(%arg0: i32) -> (i32, i32) {
    %c0_i32 = arith.constant 0 : i32
    %c0_i32_0 = arith.constant 0 : i32
    return %arg0, %c0_i32 : i32, i32
  }
  func.func @transform_6(%arg0: i32) -> (i32, i32) {
    %c0_i32 = arith.constant 0 : i32
    %c0_i32_0 = arith.constant 0 : i32
    %c0_i32_1 = arith.constant 0 : i32
    return %c0_i32, %c0_i32_0 : i32, i32
  }
}

</mosaic_0001>

<bundles_post_ra>
// kernel: rhyme_validator_forward.1
= control target key start
LH: loop header
LB: loop body
LE: loop exit
PB: predicated region body
PF: predicated region fallthrough
CT: control target
= control target key end

     0   :  { %12 = vsyncpa [#allocation4], 0  ;;  %s516_s0 = inlined_call_operand.vmem [shape: f32[2,1024], index: 0, kind: input, shape index: {}]   ;;  %s517_s1 = inlined_call_operand.hbm [shape: f32[128,128], index: 1, kind: input, shape index: {}]   ;;  %s518_s2 = inlined_call_operand.vmem [shape: f32[1,128], index: 2, kind: input, shape index: {}]   ;;  %s519_s3 = inlined_call_operand.vmem [shape: f32[1,128], index: 3, kind: input, shape index: {}]   ;;  %s520_s4 = inlined_call_operand.vmem [shape: s32[2,1], index: 4, kind: input, shape index: {}]   ;;  %s521_s5 = inlined_call_operand.hbm [shape: f32[2,128], index: 5, kind: output, shape index: {0}]   ;;  %s522_s6 = inlined_call_operand.hbm [shape: f32[1,1], index: 6, kind: output, shape index: {1}]  }
   0x1   :  { %13 = vsyncpa [#allocation5], 0 }
   0x2   :  { %14 = vsyncpa [#allocation6], 0  ;;  %s417_s21 = smov [#allocation3]   ;;  %s357_s25 = scalar_lea.hbm %s517_s1, 2048 }
   0x3   :  { %s22_s22 = sshll.u32 %s417_s21, 4  ;;  %p358_p0 = scmp.ne.s32.totalorder %s517_s1, %s357_s25  ;;  %s23_s22 = int_to_ptr.vmem [resolvable:$true] %s22_s22 }
   0x4   :  { %p361_p1 = scmp.lt.u32.totalorder %s357_s25, %s517_s1 }
   0x6   :  { %p363_p2 = pnand %p361_p1, %p358_p0 }
   0x8   :  { %366 = shalt.err (!%p363_p2)
}
   0x9   :  { %s367_s30 = scalar_lea.vmem %s23_s22, 2048  ;;  %p372_p4 = scmp.lt.s32.totalorder %s23_s22, %s23_s22 }
   0xa   :  { %p368_p3 = scmp.ne.s32.totalorder %s23_s22, %s367_s30  ;;  %p373_p5 = scmp.lt.s32.totalorder %s367_s30, %s367_s30 }
   0xc   :  { %p374_p6 = por %p373_p5, %p372_p4 }
   0xe   :  { %p375_p7 = pnand %p374_p6, %p368_p3 }
  0x10   :  { %378 = shalt.err (!%p375_p7)
}
  0x11   :  { %s418_s7 = smov 128   ;;  %s419_s8 = smov 8  }
  0x12   :  { %28 = dma.hbm_to_vmem [thread:$0]  %s517_s1, 2048, %s23_s22, [#allocation4], %s418_s7, %s418_s7, %s419_s8  }
  0x13   :  { %411 = dma.done.wait [#allocation4], 2048  }
  0x14   :  { %412 = vsyncadd [#allocation4], 4294965248  ;;  %v420_v0 = vmov 0.0|0.0   ;;  %vm421_vm0 = vmmov 0   ;;  %v422_v1 = vmov 0.0   ;;  %v47_v2 = vld [vmem:[#allocation3] sm:$0xff]  ;;  %v162_v46 = vlaneseq }
  0x15   :  { %306 = vmatprep.subr.bf16.mxu0 %v420_v0  ;;  %303 = vmatprep.mubr.msk.f32.mxu0 %vm421_vm0, %v422_v1  ;;  %v48_v3 = vld [vmem:[#allocation3 + $0x8] sm:$0xff]  ;;  %v49_v4 = vld [vmem:[#allocation3 + $0x10] sm:$0xff]  ;;  %v50_v6 = vld [vmem:[#allocation3 + $0x18] sm:$0xff]  ;;  %vm140_vm1 = vcmask 1041408   ;;  %v423_v37 = vmov 0  }
  0x16   :  { %v307_v5 = vpack.c.bf16 %v48_v3, %v47_v2  ;;  %v310_v7 = vpack.c.bf16 %v50_v6, %v49_v4  ;;  %v51_v8 = vld [vmem:[#allocation3 + $0x20] sm:$0xff]  ;;  %v52_v9 = vld [vmem:[#allocation3 + $0x28] sm:$0xff]  ;;  %v53_v11 = vld [vmem:[#allocation3 + $0x30] sm:$0xff]  ;;  %345 = vset.pattern.permute.xlu1 %v423_v37  ;;  %346 = vset.pattern.permute.xlu0 %v423_v37  ;;  %v163_v48 = vand.u32 127, %v162_v46 }
  0x17   :  { %v313_v10 = vpack.c.bf16 %v52_v9, %v51_v8  ;;  %v54_v12 = vld [vmem:[#allocation3 + $0x38] sm:$0xff]  ;;  %v55_v14 = vld [vmem:[#allocation3 + $0x40] sm:$0xff]  ;;  %v56_v15 = vld [vmem:[#allocation3 + $0x48] sm:$0xff] }
  0x18   :  { %308 = vmatpush3.bf16.msra.mxu0 %v307_v5  ;;  %v316_v13 = vpack.c.bf16 %v54_v12, %v53_v11  ;;  %v319_v16 = vpack.c.bf16 %v56_v15, %v55_v14  ;;  %v57_v17 = vld [vmem:[#allocation3 + $0x50] sm:$0xff]  ;;  %v58_v18 = vld [vmem:[#allocation3 + $0x58] sm:$0xff]  ;;  %v59_v20 = vld [vmem:[#allocation3 + $0x60] sm:$0xff] }
  0x19   :  { %309 = vmatprep.subr.bf16.mxu0 %v420_v0  ;;  %v322_v19 = vpack.c.bf16 %v58_v18, %v57_v17  ;;  %v60_v21 = vld [vmem:[#allocation3 + $0x68] sm:$0xff]  ;;  %v61_v23 = vld [vmem:[#allocation3 + $0x70] sm:$0xff]  ;;  %v62_v24 = vld [vmem:[#allocation3 + $0x78] sm:$0xff] }
  0x1a   :  { %v325_v22 = vpack.c.bf16 %v60_v21, %v59_v20  ;;  %v328_v25 = vpack.c.bf16 %v62_v24, %v61_v23  ;;  %v46_v26 = vld [vmem:[%s516_s0] sm:$0x3] }
  0x1b   :  { %v248_v27 = vld [vmem:[%s518_s2] ss:$0 sm:$0xff] }
  0x1c   :  { %311 = vmatpush3.bf16.msra.mxu0 %v310_v7  ;;  %v164_v44 = vld [vmem:[%s520_s4] sm:$0x3]  ;;  %s424_s4 = smov [#allocation7]  }
  0x1d   :  { %312 = vmatprep.subr.bf16.mxu0 %v420_v0  ;;  %v251_v50 = vld [vmem:[%s519_s3] ss:$0 sm:$0xff]  ;;  %s226_s16 = sshll.u32 %s424_s4, 4  ;;  %s227_s16 = int_to_ptr.vmem [resolvable:$true] %s226_s16 }
  0x1e   :  { %s379_s3 = scalar_lea.vmem %s227_s16, 32  ;;  %p384_p9 = scmp.lt.s32.totalorder %s227_s16, %s227_s16 }
  0x1f   :  { %p380_p8 = scmp.ne.s32.totalorder %s227_s16, %s379_s3  ;;  %p385_p10 = scmp.lt.s32.totalorder %s379_s3, %s379_s3 }
  0x20   :  { %314 = vmatpush3.bf16.msra.mxu0 %v313_v10 }
  0x21   :  { %315 = vmatprep.subr.bf16.mxu0 %v420_v0  ;;  %p386_p11 = por %p385_p10, %p384_p9 }
  0x23   :  { %p387_p12 = pnand %p386_p11, %p380_p8 }
  0x24   :  { %317 = vmatpush3.bf16.msra.mxu0 %v316_v13 }
  0x25   :  { %318 = vmatprep.subr.bf16.mxu0 %v420_v0 }
  0x28   :  { %320 = vmatpush3.bf16.msra.mxu0 %v319_v16 }
  0x29   :  { %321 = vmatprep.subr.bf16.mxu0 %v420_v0 }
  0x2c   :  { %323 = vmatpush3.bf16.msra.mxu0 %v322_v19 }
  0x2d   :  { %324 = vmatprep.subr.bf16.mxu0 %v420_v0 }
  0x30   :  { %326 = vmatpush3.bf16.msra.mxu0 %v325_v22 }
  0x31   :  { %327 = vmatprep.subr.bf16.mxu0 %v420_v0 }
  0x34   :  { %329 = vmatpush3.bf16.msra.mxu0 %v328_v25 }
  0x37   :  { %304 = vmatmul.mubr.f32.vlgmr.msra.gmra.mrb[0].mxu0 %v46_v26 }
 0x10a   :  { %v136_v28 = vpop.f32.mrb[0].mxu0 }
 0x10b   :  { %v137_v29 = vadd.f32 %v248_v27, %v136_v28  ;;  %v305_v30 = vpop.f32.mrb[1].mxu0 }
 0x10d   :  { %v141_v31 = vsel %vm140_vm1, %v137_v29, -inf }
 0x10e   :  { %142 = vmax.xlane.f32.xlu0 %v141_v31 }
 0x19b   :  { %v143_v32 = vpop.xlane.xlu0 %142 }
 0x19c   :  { %v144_v33 = vsub.f32 %v137_v29, %v143_v32 }
 0x19e   :  { %v145_v34 = vmul.f32 1.442695, %v144_v33 }
 0x1a0   :  { %347 = vpow2.f32 %v145_v34 }
 0x1aa   :  { %v348_v35 = vpop.eup %347 }
 0x1ab   :  { %v147_v36 = vsel %vm140_vm1, %v348_v35, 0.0 }
 0x1ac   :  { %148 = vadd.xlane.f32.xlu0 %v147_v36 }
 0x239   :  { %v149_v38 = vpop.xlane.xlu0 %148 }
 0x23a   :  { %349 = vrcp.f32 %v149_v38 }
 0x244   :  { %v350_v39 = vpop.eup %349 }
 0x245   :  { %v151_v40 = vmul.f32 %v350_v39, %v348_v35 }
 0x247   :  { %152 = vst [vmem:[#allocation7] sm:$0x3] %v151_v40  ;;  %v153_v41 = vmul.f32 1.442695, %v151_v40 }
 0x249   :  { %351 = vpow2.f32 %v153_v41 }
 0x253   :  { %v352_v42 = vpop.eup %351 }
 0x254   :  { %v155_v43 = vsel %vm140_vm1, %v352_v42, 0.0 }
 0x255   :  { %156 = vadd.xlane.f32.xlu1 %v155_v43 }
 0x266   :  { %166 = vperm.xlu1 %345, %v164_v44  }
 0x2e2   :  { %v157_v45 = vpop.xlane.xlu1 %156 }
 0x2e3   :  { %v249_v47 = vadd.f32 -83.0, %v157_v45 }
 0x2e5   :  { %353 = vlog2.f32 %v249_v47 }
 0x2e6   :  { %v167_v49 = vpop.permute.xlu1 %166 }
 0x2e7   :  { %vm168_vm2 = vcmp.eq.s32.totalorder %v163_v48, %v167_v49 }
 0x2e8   :  { %v250_v51 = vsel %vm168_vm2, 1.0, %v422_v1 }
 0x2e9   :  { %v178_v54 = vmul.f32 %v251_v50, %v250_v51 }
 0x2eb   :  { %v196_v58 = vsel %vm140_vm1, %v178_v54, 0.0 }
 0x2ef   :  { %v354_v52 = vpop.eup %353 }
 0x2f0   :  { %v160_v53 = vmul.f32 0.6931472, %v354_v52 }
 0x2f2   :  { %v161_v55 = vsub.f32 %v151_v40, %v160_v53 }
 0x2f4   :  { %v180_v56 = vmul.f32 %v178_v54, %v161_v55 }
 0x2f6   :  { %v181_v57 = vsel %vm140_vm1, %v180_v56, 0.0 }
 0x2f7   :  { %182 = vadd.xlane.f32.xlu0 %v181_v57 }
 0x2fb   :  { %197 = vadd.xlane.f32.xlu0 %v196_v58 }
 0x384   :  { %v183_v59 = vpop.xlane.xlu0 %182 }
 0x385   :  { %v184_v60 = vrot.slane %v183_v59, 4 }
 0x387   :  { %v185_v61 = vadd.f32 %v184_v60, %v183_v59 }
 0x388   :  { %v198_v62 = vpop.xlane.xlu0 %197 }
 0x389   :  { %390 = shalt.err (!%p387_p12)
}
 0x38a   :  { %s391_s19 = scalar_lea.hbm %s521_s5, 32 }
 0x38b   :  { %p392_p13 = scmp.ne.s32.totalorder %s521_s5, %s391_s19  ;;  %p395_p0 = scmp.lt.u32.totalorder %s391_s19, %s521_s5 }
 0x38d   :  { %p397_p1 = pnand %p395_p0, %p392_p13 }
 0x38f   :  { %400 = shalt.err (!%p397_p1)
}
 0x390   :  { %229 = dma.vmem_to_hbm [thread:$0]  %s227_s16, 32, %s521_s5, [#allocation5]   ;;  %v186_v63 = vrot.slane %v185_v61, 2  ;;  %v199_v0 = vrot.slane %v198_v62, 4 }
 0x391   :  { %s401_s8 = scalar_lea.hbm %s522_s6, 16 }
 0x392   :  { %v200_v1 = vadd.f32 %v199_v0, %v198_v62  ;;  %v187_v2 = vadd.f32 %v186_v63, %v185_v61  ;;  %p402_p2 = scmp.ne.s32.totalorder %s522_s6, %s401_s8  ;;  %p405_p3 = scmp.lt.u32.totalorder %s401_s8, %s522_s6 }
 0x394   :  { %v201_v3 = vrot.slane %v200_v1, 2  ;;  %v188_v4 = vrot.slane %v187_v2, 1  ;;  %p407_p4 = pnand %p405_p3, %p402_p2 }
 0x396   :  { %v202_v5 = vadd.f32 %v201_v3, %v200_v1  ;;  %v189_v6 = vadd.f32 %v188_v4, %v187_v2 }
 0x398   :  { %330 = vpush %v189_v6  ;;  %v203_v7 = vrot.slane %v202_v5, 1 }
 0x39a   :  { %v204_v8 = vadd.f32 %v203_v7, %v202_v5 }
 0x39c   :  { %332 = vpush %v204_v8 }
 0x3c9   :  { %s331_s26 = spop %330 }
 0x3ca   :  { %s191_s28 = ssub.f32 0.0, %s331_s26 }
 0x3cd   :  { %s333_s27 = spop %332 }
 0x3ce   :  { %v214_v9 = vstv %s333_s27 }
 0x3cf   :  { %355 = vrcp.f32 %v214_v9 }
 0x3d9   :  { %v356_v10 = vpop.eup %355 }
 0x3da   :  { %334 = vpush %v356_v10 }
 0x40b   :  { %s335_s5 = spop %334 }
 0x40c   :  { %s217_s29 = smul.f32 %s335_s5, %s191_s28 }
 0x40e   :  { %219 = sst [smem:[#allocation8]] %s217_s29 }
 0x40f   :  { %410 = shalt.err (!%p407_p4)
}
 0x410   :  { %s425_s12 = smov [#allocation8]  }
 0x411   :  { %237 = dma.smem_to_hbm %s425_s12, 16, %s522_s6, [#allocation6]  }
 0x412   :  { %413 = dma.done.wait [#allocation5], 32  }
 0x413   :  { %414 = vsyncadd [#allocation5], 4294967264 }
 0x414   :  { %415 = dma.done.wait [#allocation6], 16  }
 0x415   :  { %416 = vsyncadd [#allocation6], 4294967280 }
 0x416   :  { %244 = sfence }
 0x417   :  { %245 = vsyncpa [#allocation4], 1 }
 0x418   :  { %246 = vsyncpa [#allocation5], 1 }
 0x419   :  { %247 = vsyncpa [#allocation6], 1 }

</bundles_post_ra>
